<compile_context>
chip_gen: v6e
topology: v6e:2x2x1
jax: 0.10.0
libtpu: 0.0.40
codegen_flags: <defaults>
</compile_context>

<pallas_src>
import jax
import jax.numpy as jnp
from jax.experimental import pallas as pl
from jax.experimental.pallas import tpu as pltpu


def _softq_kernel(s_ref, a_ref,
                  w1s_ref, w1a_ref, b1_ref,
                  w2_ref, b2_ref,
                  w3_ref, b3_ref,
                  w4_ref, b4_ref,
                  out_ref):
    s = s_ref[...]                         # (TB, num_inputs)  f32
    a = a_ref[...]                         # (TB, num_actions) f32

    # Layer 1: split matmul over (state, action) == Linear on cat([state, action]).
    h = (jnp.dot(s, w1s_ref[...], preferred_element_type=jnp.float32)
         + jnp.dot(a, w1a_ref[...], preferred_element_type=jnp.float32)
         + b1_ref[...])
    h = jnp.maximum(h, 0.0)

    h = jnp.dot(h, w2_ref[...], preferred_element_type=jnp.float32) + b2_ref[...]
    h = jnp.maximum(h, 0.0)

    h = jnp.dot(h, w3_ref[...], preferred_element_type=jnp.float32) + b3_ref[...]
    h = jnp.maximum(h, 0.0)

    # Layer 4 (H -> 1), emitted lane-dense: contract w4 (1, H) against h (TB, H)
    # along H -> (1, TB) so the batch dim lands on lanes and the store is a
    # plain wide vst (no masked single-lane stores).
    y = pl.dot(w4_ref[...], h, trans_b=True)          # (1, TB) f32
    out_ref[...] = (y + b4_ref[...]).astype(out_ref.dtype)


def _round_up(x, m):
    return ((x + m - 1) // m) * m


def _resident_spec(arr):
    # Full-array block whose block index never changes -> stays VMEM-resident
    # across all grid steps.  (All weights/biases here are 2-D and tiny;
    # skipping the optional single-buffering hint costs only ~60 KiB.)
    return pl.BlockSpec(arr.shape, lambda i: (0, 0))


def soft_q_forward(state, action, params, *, tile_b=2048):
    """state: (B, num_inputs), action: (B, num_actions) -> (B, 1) float32 Q-values."""
    B, num_inputs = state.shape
    _, num_actions = action.shape

    (w1, b1), (w2, b2), (w3, b3), (w4, b4) = params
    hidden = w1.shape[1]

    # Split W1 so the kernel consumes state/action directly (no HBM concat).
    w1_s = w1[:num_inputs].astype(jnp.float32)            # (num_inputs, H)
    w1_a = w1[num_inputs:].astype(jnp.float32)            # (num_actions, H)
    w2f = w2.astype(jnp.float32)
    w3f = w3.astype(jnp.float32)
    w4_row = w4.reshape(1, hidden).astype(jnp.float32)    # (1, H) for the head
    b1f = b1.reshape(1, hidden).astype(jnp.float32)
    b2f = b2.reshape(1, hidden).astype(jnp.float32)
    b3f = b3.reshape(1, hidden).astype(jnp.float32)
    b4f = b4.reshape(1, 1).astype(jnp.float32)

    state = state.astype(jnp.float32)
    action = action.astype(jnp.float32)

    # Batch tile: whole batch if it fits one tile, otherwise a multiple-of-128
    # tile chosen so the grid has an EVEN step count (both v7x TCs get work).
    if B <= tile_b:
        tb = B
    else:
        steps = pl.cdiv(B, tile_b)
        if steps % 2 == 1:
            steps += 1
        tb = _round_up(pl.cdiv(B, steps), 128)
    grid = (pl.cdiv(B, tb),)
    # If B is not a multiple of tb the last block is partial; Pallas clips the
    # partial output block and the network is purely row-wise, so padded rows
    # cannot contaminate valid rows.

    in_specs = [
        pl.BlockSpec((tb, num_inputs), lambda i: (i, 0)),
        pl.BlockSpec((tb, num_actions), lambda i: (i, 0)),
        _resident_spec(w1_s), _resident_spec(w1_a), _resident_spec(b1f),
        _resident_spec(w2f), _resident_spec(b2f),
        _resident_spec(w3f), _resident_spec(b3f),
        _resident_spec(w4_row), _resident_spec(b4f),
    ]
    # Lane-dense output: (1, B) with batch on lanes.
    out_spec = pl.BlockSpec((1, tb), lambda i: (0, i))

    out_row = pl.pallas_call(
        _softq_kernel,
        out_shape=jax.ShapeDtypeStruct((1, B), jnp.float32),
        grid=grid,
        in_specs=in_specs,
        out_specs=out_spec,
        compiler_params=pltpu.CompilerParams(
            dimension_semantics=("parallel",),        # batch tiles across v7x's 2 TCs
            vmem_limit_bytes=32 * 1024 * 1024),       # lane-padded, double-buffered tiles
    )(state, action, w1_s, w1_a, b1f, w2f, b2f, w3f, b3f, w4_row, b4f)

    return out_row.reshape(B, 1)


def soft_q_reference(state, action, params):
    """Pure-JAX reference of the exact PyTorch forward."""
    x = jnp.concatenate([state, action], axis=1)
    for i, (w, b) in enumerate(params):
        x = x @ w + b.reshape(1, -1)
        if i < len(params) - 1:
            x = jnp.maximum(x, 0.0)
    return x


def init_soft_q_params(key, num_inputs, num_actions, hidden_size, init_w=0.003):
    """Synthetic init mirroring the PyTorch module's shapes.

    Weights stored as (in_features, out_features) = W^T relative to torch.
    Hidden layers ~ U(-1/sqrt(fan_in), 1/sqrt(fan_in)); last layer ~ U(-init_w, init_w).
    """
    d_in = num_inputs + num_actions
    dims = [(d_in, hidden_size), (hidden_size, hidden_size),
            (hidden_size, hidden_size), (hidden_size, 1)]
    keys = jax.random.split(key, 2 * len(dims))
    params = []
    for i, (fan_in, fan_out) in enumerate(dims):
        bound = init_w if i == len(dims) - 1 else 1.0 / (fan_in ** 0.5)
        w = jax.random.uniform(keys[2 * i], (fan_in, fan_out),
                               minval=-bound, maxval=bound, dtype=jnp.float32)
        b = jax.random.uniform(keys[2 * i + 1], (1, fan_out),
                               minval=-bound, maxval=bound, dtype=jnp.float32)
        params.append((w, b))
    return params


if __name__ == "__main__":
    num_inputs, num_actions, hidden_size = 12, 4, 32

    key = jax.random.PRNGKey(0)
    k_s, k_a, k_p, k_s2, k_a2 = jax.random.split(key, 5)
    params = init_soft_q_params(k_p, num_inputs, num_actions, hidden_size)

    # Small case: single grid step, full-batch tile.
    batch = 8
    state = jax.random.normal(k_s, (batch, num_inputs), dtype=jnp.float32)
    action = jax.random.normal(k_a, (batch, num_actions), dtype=jnp.float32)
    out = soft_q_forward(state, action, params)
    jax.block_until_ready(out)
    ref = soft_q_reference(state, action, params)
    assert out.shape == (batch, 1)
    assert jnp.allclose(out, ref, atol=1e-4, rtol=1e-4), "mismatch vs reference (B=8)"

    # Larger batch exercises the batch grid: 2 even steps of 2048 rows,
    # VMEM-resident weights, lane-dense (1, B) output.
    batch2 = 4096
    state2 = jax.random.normal(k_s2, (batch2, num_inputs), dtype=jnp.float32)
    action2 = jax.random.normal(k_a2, (batch2, num_actions), dtype=jnp.float32)
    out2 = soft_q_forward(state2, action2, params)
    jax.block_until_ready(out2)
    ref2 = soft_q_reference(state2, action2, params)
    assert out2.shape == (batch2, 1)
    assert jnp.allclose(out2, ref2, atol=1e-4, rtol=1e-4), "mismatch vs reference (B=4096)"

    print("KERNEL_OK")
</pallas_src>

<mosaic_0001>
module attributes {stable_mosaic.version = 11 : i64} {
  func.func @_softq_kernel(%arg0: i32, %arg1: memref<8x12xf32, #tpu.memory_space<vmem>>, %arg2: memref<8x4xf32, #tpu.memory_space<vmem>>, %arg3: memref<12x32xf32, #tpu.memory_space<vmem>>, %arg4: memref<4x32xf32, #tpu.memory_space<vmem>>, %arg5: memref<1x32xf32, #tpu.memory_space<vmem>>, %arg6: memref<32x32xf32, #tpu.memory_space<vmem>>, %arg7: memref<1x32xf32, #tpu.memory_space<vmem>>, %arg8: memref<32x32xf32, #tpu.memory_space<vmem>>, %arg9: memref<1x32xf32, #tpu.memory_space<vmem>>, %arg10: memref<1x32xf32, #tpu.memory_space<vmem>>, %arg11: memref<1x1xf32, #tpu.memory_space<vmem>>, %arg12: memref<1x8xf32, #tpu.memory_space<vmem>>) attributes {dimension_semantics = [#tpu.dimension_semantics<parallel>], iteration_bounds = array<i64: 1>, scalar_prefetch = 0 : i64, scratch_operands = 0 : i64, tpu.core_type = #tpu.core_type<tc>, window_params = [{transform_indices = @transform_0, window_bounds = array<i64: 8, 12>}, {transform_indices = @transform_1, window_bounds = array<i64: 8, 4>}, {pipeline_mode = #tpu.pipeline_mode<synchronous>, transform_indices = @transform_2, window_bounds = array<i64: 12, 32>}, {pipeline_mode = #tpu.pipeline_mode<synchronous>, transform_indices = @transform_3, window_bounds = array<i64: 4, 32>}, {pipeline_mode = #tpu.pipeline_mode<synchronous>, transform_indices = @transform_4, window_bounds = array<i64: 1, 32>}, {pipeline_mode = #tpu.pipeline_mode<synchronous>, transform_indices = @transform_5, window_bounds = array<i64: 32, 32>}, {pipeline_mode = #tpu.pipeline_mode<synchronous>, transform_indices = @transform_6, window_bounds = array<i64: 1, 32>}, {pipeline_mode = #tpu.pipeline_mode<synchronous>, transform_indices = @transform_7, window_bounds = array<i64: 32, 32>}, {pipeline_mode = #tpu.pipeline_mode<synchronous>, transform_indices = @transform_8, window_bounds = array<i64: 1, 32>}, {pipeline_mode = #tpu.pipeline_mode<synchronous>, transform_indices = @transform_9, window_bounds = array<i64: 1, 32>}, {pipeline_mode = #tpu.pipeline_mode<synchronous>, transform_indices = @transform_10, window_bounds = array<i64: 1, 1>}, {transform_indices = @transform_11, window_bounds = array<i64: 1, 8>}]} {
    %c0 = arith.constant 0 : index
    %c0_0 = arith.constant 0 : index
    %0 = vector.load %arg1[%c0, %c0_0] : memref<8x12xf32, #tpu.memory_space<vmem>>, vector<8x12xf32>
    %c0_1 = arith.constant 0 : index
    %c0_2 = arith.constant 0 : index
    %1 = vector.load %arg2[%c0_1, %c0_2] : memref<8x4xf32, #tpu.memory_space<vmem>>, vector<8x4xf32>
    %c0_3 = arith.constant 0 : index
    %c0_4 = arith.constant 0 : index
    %2 = vector.load %arg3[%c0_3, %c0_4] : memref<12x32xf32, #tpu.memory_space<vmem>>, vector<12x32xf32>
    %cst = arith.constant dense<0.000000e+00> : vector<8x32xf32>
    %3 = tpu.matmul %0, %2, %cst {dimension_numbers = #tpu.dot_dimension_numbers<[1], [0], [0], [1], [0, 0, 1, 1], [], []>} : vector<8x12xf32>, vector<12x32xf32>, vector<8x32xf32> -> vector<8x32xf32>
    %c0_5 = arith.constant 0 : index
    %c0_6 = arith.constant 0 : index
    %4 = vector.load %arg4[%c0_5, %c0_6] : memref<4x32xf32, #tpu.memory_space<vmem>>, vector<4x32xf32>
    %cst_7 = arith.constant dense<0.000000e+00> : vector<8x32xf32>
    %5 = tpu.matmul %1, %4, %cst_7 {dimension_numbers = #tpu.dot_dimension_numbers<[1], [0], [0], [1], [0, 0, 1, 1], [], []>} : vector<8x4xf32>, vector<4x32xf32>, vector<8x32xf32> -> vector<8x32xf32>
    %6 = arith.addf %3, %5 : vector<8x32xf32>
    %c0_8 = arith.constant 0 : index
    %c0_9 = arith.constant 0 : index
    %7 = vector.load %arg5[%c0_8, %c0_9] : memref<1x32xf32, #tpu.memory_space<vmem>>, vector<1x32xf32>
    %8 = vector.broadcast %7 : vector<1x32xf32> to vector<8x32xf32>
    %9 = arith.addf %6, %8 : vector<8x32xf32>
    %cst_10 = arith.constant 0.000000e+00 : f32
    %10 = vector.broadcast %cst_10 : f32 to vector<8x32xf32>
    %11 = arith.maximumf %9, %10 : vector<8x32xf32>
    %c0_11 = arith.constant 0 : index
    %c0_12 = arith.constant 0 : index
    %12 = vector.load %arg6[%c0_11, %c0_12] : memref<32x32xf32, #tpu.memory_space<vmem>>, vector<32x32xf32>
    %cst_13 = arith.constant dense<0.000000e+00> : vector<8x32xf32>
    %13 = tpu.matmul %11, %12, %cst_13 {dimension_numbers = #tpu.dot_dimension_numbers<[1], [0], [0], [1], [0, 0, 1, 1], [], []>} : vector<8x32xf32>, vector<32x32xf32>, vector<8x32xf32> -> vector<8x32xf32>
    %c0_14 = arith.constant 0 : index
    %c0_15 = arith.constant 0 : index
    %14 = vector.load %arg7[%c0_14, %c0_15] : memref<1x32xf32, #tpu.memory_space<vmem>>, vector<1x32xf32>
    %15 = vector.broadcast %14 : vector<1x32xf32> to vector<8x32xf32>
    %16 = arith.addf %13, %15 : vector<8x32xf32>
    %cst_16 = arith.constant 0.000000e+00 : f32
    %17 = vector.broadcast %cst_16 : f32 to vector<8x32xf32>
    %18 = arith.maximumf %16, %17 : vector<8x32xf32>
    %c0_17 = arith.constant 0 : index
    %c0_18 = arith.constant 0 : index
    %19 = vector.load %arg8[%c0_17, %c0_18] : memref<32x32xf32, #tpu.memory_space<vmem>>, vector<32x32xf32>
    %cst_19 = arith.constant dense<0.000000e+00> : vector<8x32xf32>
    %20 = tpu.matmul %18, %19, %cst_19 {dimension_numbers = #tpu.dot_dimension_numbers<[1], [0], [0], [1], [0, 0, 1, 1], [], []>} : vector<8x32xf32>, vector<32x32xf32>, vector<8x32xf32> -> vector<8x32xf32>
    %c0_20 = arith.constant 0 : index
    %c0_21 = arith.constant 0 : index
    %21 = vector.load %arg9[%c0_20, %c0_21] : memref<1x32xf32, #tpu.memory_space<vmem>>, vector<1x32xf32>
    %22 = vector.broadcast %21 : vector<1x32xf32> to vector<8x32xf32>
    %23 = arith.addf %20, %22 : vector<8x32xf32>
    %cst_22 = arith.constant 0.000000e+00 : f32
    %24 = vector.broadcast %cst_22 : f32 to vector<8x32xf32>
    %25 = arith.maximumf %23, %24 : vector<8x32xf32>
    %c0_23 = arith.constant 0 : index
    %c0_24 = arith.constant 0 : index
    %26 = vector.load %arg10[%c0_23, %c0_24] : memref<1x32xf32, #tpu.memory_space<vmem>>, vector<1x32xf32>
    %cst_25 = arith.constant dense<0.000000e+00> : vector<1x8xf32>
    %27 = tpu.matmul %26, %25, %cst_25 {dimension_numbers = #tpu.dot_dimension_numbers<[1], [1], [0], [0], [0, 0, 1, 0], [], []>} : vector<1x32xf32>, vector<8x32xf32>, vector<1x8xf32> -> vector<1x8xf32>
    %c0_26 = arith.constant 0 : index
    %c0_27 = arith.constant 0 : index
    %28 = vector.load %arg11[%c0_26, %c0_27] : memref<1x1xf32, #tpu.memory_space<vmem>>, vector<1x1xf32>
    %29 = vector.broadcast %28 : vector<1x1xf32> to vector<1x8xf32>
    %30 = arith.addf %27, %29 : vector<1x8xf32>
    %c0_28 = arith.constant 0 : index
    %c0_29 = arith.constant 0 : index
    %31 = vector.load %arg12[%c0_28, %c0_29] : memref<1x8xf32, #tpu.memory_space<vmem>>, vector<1x8xf32>
    tpu.vector_store %arg12[%c0_28, %c0_29], %30 {strides = array<i32>} : memref<1x8xf32, #tpu.memory_space<vmem>>, vector<1x8xf32>,
    return
  }
  func.func @transform_0(%arg0: i32) -> (i32, i32) {
    %c0_i32 = arith.constant 0 : i32
    %c0_i32_0 = arith.constant 0 : i32
    return %arg0, %c0_i32 : i32, i32
  }
  func.func @transform_1(%arg0: i32) -> (i32, i32) {
    %c0_i32 = arith.constant 0 : i32
    %c0_i32_0 = arith.constant 0 : i32
    return %arg0, %c0_i32 : i32, i32
  }
  func.func @transform_2(%arg0: i32) -> (i32, i32) {
    %c0_i32 = arith.constant 0 : i32
    %c0_i32_0 = arith.constant 0 : i32
    %c0_i32_1 = arith.constant 0 : i32
    return %c0_i32, %c0_i32_0 : i32, i32
  }
  func.func @transform_3(%arg0: i32) -> (i32, i32) {
    %c0_i32 = arith.constant 0 : i32
    %c0_i32_0 = arith.constant 0 : i32
    %c0_i32_1 = arith.constant 0 : i32
    return %c0_i32, %c0_i32_0 : i32, i32
  }
  func.func @transform_4(%arg0: i32) -> (i32, i32) {
    %c0_i32 = arith.constant 0 : i32
    %c0_i32_0 = arith.constant 0 : i32
    %c0_i32_1 = arith.constant 0 : i32
    return %c0_i32, %c0_i32_0 : i32, i32
  }
  func.func @transform_5(%arg0: i32) -> (i32, i32) {
    %c0_i32 = arith.constant 0 : i32
    %c0_i32_0 = arith.constant 0 : i32
    %c0_i32_1 = arith.constant 0 : i32
    return %c0_i32, %c0_i32_0 : i32, i32
  }
  func.func @transform_6(%arg0: i32) -> (i32, i32) {
    %c0_i32 = arith.constant 0 : i32
    %c0_i32_0 = arith.constant 0 : i32
    %c0_i32_1 = arith.constant 0 : i32
    return %c0_i32, %c0_i32_0 : i32, i32
  }
  func.func @transform_7(%arg0: i32) -> (i32, i32) {
    %c0_i32 = arith.constant 0 : i32
    %c0_i32_0 = arith.constant 0 : i32
    %c0_i32_1 = arith.constant 0 : i32
    return %c0_i32, %c0_i32_0 : i32, i32
  }
  func.func @transform_8(%arg0: i32) -> (i32, i32) {
    %c0_i32 = arith.constant 0 : i32
    %c0_i32_0 = arith.constant 0 : i32
    %c0_i32_1 = arith.constant 0 : i32
    return %c0_i32, %c0_i32_0 : i32, i32
  }
  func.func @transform_9(%arg0: i32) -> (i32, i32) {
    %c0_i32 = arith.constant 0 : i32
    %c0_i32_0 = arith.constant 0 : i32
    %c0_i32_1 = arith.constant 0 : i32
    return %c0_i32, %c0_i32_0 : i32, i32
  }
  func.func @transform_10(%arg0: i32) -> (i32, i32) {
    %c0_i32 = arith.constant 0 : i32
    %c0_i32_0 = arith.constant 0 : i32
    %c0_i32_1 = arith.constant 0 : i32
    return %c0_i32, %c0_i32_0 : i32, i32
  }
  func.func @transform_11(%arg0: i32) -> (i32, i32) {
    %c0_i32 = arith.constant 0 : i32
    %c0_i32_0 = arith.constant 0 : i32
    return %c0_i32, %arg0 : i32, i32
  }
}

</mosaic_0001>

<bundles_post_ra>
// kernel: tpu_custom_call.1
= control target key start
LH: loop header
LB: loop body
LE: loop exit
PB: predicated region body
PF: predicated region fallthrough
CT: control target
= control target key end

     0   :  { %s842_s0 = inlined_call_operand.hbm [shape: f32[8,12], index: 0, kind: input, shape index: {}]   ;;  %s843_s1 = inlined_call_operand.vmem [shape: f32[8,4], index: 1, kind: input, shape index: {}]   ;;  %s844_s2 = inlined_call_operand.vmem [shape: f32[12,32], index: 2, kind: input, shape index: {}]   ;;  %s845_s3 = inlined_call_operand.hbm [shape: f32[4,32], index: 3, kind: input, shape index: {}]   ;;  %s846_s4 = inlined_call_operand.vmem [shape: f32[1,32], index: 4, kind: input, shape index: {}]   ;;  %s847_s5 = inlined_call_operand.hbm [shape: f32[32,32], index: 5, kind: input, shape index: {}]   ;;  %s848_s6 = inlined_call_operand.vmem [shape: f32[1,32], index: 6, kind: input, shape index: {}]   ;;  %s849_s7 = inlined_call_operand.hbm [shape: f32[32,32], index: 7, kind: input, shape index: {}]   ;;  %s850_s8 = inlined_call_operand.vmem [shape: f32[1,32], index: 8, kind: input, shape index: {}]   ;;  %s851_s9 = inlined_call_operand.vmem [shape: f32[1,32], index: 9, kind: input, shape index: {}]   ;;  %s852_s10 = inlined_call_operand.<no memory space> [shape: f32[1,1], index: 10, kind: input, shape index: {}]   ;;  %s853_s11 = inlined_call_operand.hbm [shape: f32[1,8], index: 11, kind: output, shape index: {}]  }
   0x1   :  { %v16_v0 = vstv %s852_s10 }
   0x2   :  { %17 = vst [vmem:[#allocation2] sm:$0x1] %v16_v0 }
   0x3   :  { %18 = vsyncpa [#allocation4], 0 }
   0x4   :  { %19 = vsyncpa [#allocation7], 0 }
   0x5   :  { %20 = vsyncpa [#allocation10], 0 }
   0x6   :  { %21 = vsyncpa [#allocation5], 0  ;;  %s724_s19 = smov [#allocation6]   ;;  %s725_s21 = smov [#allocation3]  }
   0x7   :  { %s42_s20 = sshll.u32 %s724_s19, 4  ;;  %s28_s22 = sshll.u32 %s725_s21, 4  ;;  %s43_s20 = int_to_ptr.vmem [resolvable:$true] %s42_s20  ;;  %s29_s22 = int_to_ptr.vmem [resolvable:$true] %s28_s22 }
   0x8   :  { %s624_s23 = scalar_lea.vmem %s43_s20, 64  ;;  %p629_p1 = scmp.lt.s32.totalorder %s43_s20, %s43_s20 }
   0x9   :  { %p625_p0 = scmp.ne.s32.totalorder %s43_s20, %s624_s23  ;;  %p630_p2 = scmp.lt.s32.totalorder %s624_s23, %s624_s23 }
   0xb   :  { %p631_p3 = por %p630_p2, %p629_p1 }
   0xd   :  { %p632_p4 = pnand %p631_p3, %p625_p0 }
   0xf   :  { %635 = shalt.err (!%p632_p4)
}
  0x10   :  { %45 = dma.hbm_to_vmem [thread:$0]  %s845_s3, 64, %s43_s20, [#allocation7]  }
  0x11   :  { %s644_s25 = scalar_lea.vmem %s29_s22, 128  ;;  %p649_p6 = scmp.lt.s32.totalorder %s29_s22, %s29_s22 }
  0x12   :  { %p645_p5 = scmp.ne.s32.totalorder %s29_s22, %s644_s25  ;;  %p650_p7 = scmp.lt.s32.totalorder %s644_s25, %s644_s25 }
  0x14   :  { %p651_p8 = por %p650_p7, %p649_p6 }
  0x16   :  { %p652_p9 = pnand %p651_p8, %p645_p5 }
  0x18   :  { %655 = shalt.err (!%p652_p9)
}
  0x19   :  { %31 = dma.hbm_to_vmem [thread:$0]  %s842_s0, 128, %s29_s22, [#allocation4]  }
  0x1a   :  { %s726_s28 = smov [#allocation8]  }
  0x1b   :  { %s53_s29 = sshll.u32 %s726_s28, 4  ;;  %s54_s29 = int_to_ptr.vmem [resolvable:$true] %s53_s29 }
  0x1c   :  { %s664_s30 = scalar_lea.vmem %s54_s29, 512  ;;  %p669_p11 = scmp.lt.s32.totalorder %s54_s29, %s54_s29 }
  0x1d   :  { %p665_p10 = scmp.ne.s32.totalorder %s54_s29, %s664_s30  ;;  %p670_p12 = scmp.lt.s32.totalorder %s664_s30, %s664_s30 }
  0x1f   :  { %p671_p13 = por %p670_p12, %p669_p11 }
  0x21   :  { %p672_p0 = pnand %p671_p13, %p665_p10 }
  0x23   :  { %675 = shalt.err (!%p672_p0)
}
  0x24   :  { %s727_s3 = smov 128   ;;  %s728_s12 = smov 8  }
  0x25   :  { %59 = dma.hbm_to_vmem [thread:$0]  %s847_s5, 512, %s54_s29, [#allocation7], %s727_s3, %s727_s3, %s728_s12  }
  0x26   :  { %s729_s15 = smov [#allocation9]  }
  0x27   :  { %s67_s16 = sshll.u32 %s729_s15, 4  ;;  %s68_s16 = int_to_ptr.vmem [resolvable:$true] %s67_s16 }
  0x28   :  { %s684_s0 = scalar_lea.vmem %s68_s16, 512  ;;  %p689_p2 = scmp.lt.s32.totalorder %s68_s16, %s68_s16 }
  0x29   :  { %p685_p1 = scmp.ne.s32.totalorder %s68_s16, %s684_s0  ;;  %p690_p3 = scmp.lt.s32.totalorder %s684_s0, %s684_s0 }
  0x2b   :  { %p691_p4 = por %p690_p3, %p689_p2 }
  0x2d   :  { %p692_p5 = pnand %p691_p4, %p685_p1 }
  0x2f   :  { %695 = shalt.err (!%p692_p5)
}
  0x30   :  { %73 = dma.hbm_to_vmem [thread:$0]  %s849_s7, 512, %s68_s16, [#allocation10], %s727_s3, %s727_s3, %s728_s12  }
  0x31   :  { %716 = dma.done.wait [#allocation4], 128  }
  0x32   :  { %717 = vsyncadd [#allocation4], 4294967168 }
  0x33   :  { %718 = dma.done.wait [#allocation7], 576  }
  0x34   :  { %719 = vsyncadd [#allocation7], 4294966720 }
  0x35   :  { %720 = dma.done.wait [#allocation10], 512  }
  0x36   :  { %721 = vsyncadd [#allocation10], 4294966784  ;;  %v730_v1 = vmov 0.0   ;;  %vm731_vm0 = vmmov 0   ;;  %vm101_vm1 = vcmask 1043456   ;;  %vm97_vm2 = vcmask 31744  }
  0x37   :  { %566 = vmatprep.subr.mxu0 %v730_v1  ;;  %571 = vmatprep.subr.mxu1 %v730_v1  ;;  %v96_v2 = vld [vmem:[#allocation6] sm:$0xf]  ;;  %v93_v4 = vld [vmem:[%s843_s1] sm:$0xff]  ;;  %vm175_vm3 = vcmask 97280   ;;  %v262_v9 = vld [vmem:[#allocation8 + $0x8] sm:$0xff]  ;;  %vm272_vm4 = vcmask 261120   ;;  %v439_v36 = vlaneseq }
  0x38   :  { %568 = vmatprep.mubr.msk.f32.mxu0 %vm731_vm0, %v730_v1  ;;  %575 = vmatprep.mubr.msk.f32.mxu1 %vm731_vm0, %v730_v1  ;;  %v95_v3 = vld [vmem:[%s844_s2 + $0x8] sm:$0xf]  ;;  %v94_v5 = vld [vmem:[%s844_s2] sm:$0xff]  ;;  %v261_v10 = vld [vmem:[#allocation8] sm:$0xff]  ;;  %v732_v29 = vmov 0   ;;  %s733_s26 = smov [#allocation11]  }
  0x39   :  { %567 = vmatpush3.msk.msra.mxu0 %vm101_vm1, %v96_v2  ;;  %572 = vmatpush3.msk.msra.mxu1 %vm101_vm1, %v95_v3  ;;  %v92_v6 = vld [vmem:[#allocation3] sm:$0xff]  ;;  %v542_v15 = vld [vmem:[%s846_s4] ss:$0 sm:$0xff]  ;;  %v348_v21 = vld [vmem:[#allocation9 + $0x8] sm:$0xff]  ;;  %v440_v37 = vshrl.u32 %v439_v36, 7  ;;  %s527_s27 = sshll.u32 %s733_s26, 4  ;;  %s528_s27 = int_to_ptr.vmem [resolvable:$true] %s527_s27 }
  0x3a   :  { %569 = vmatmul.mubr.msk.f32.vlgmr.msra.gmra.mxu0 %vm97_vm2, %v93_v4  ;;  %573 = vmatprep.subr.mxu1 %v730_v1  ;;  %v264_v7 = vld [vmem:[#allocation8 + $0x18] sm:$0xff]  ;;  %v263_v8 = vld [vmem:[#allocation8 + $0x10] sm:$0xff]  ;;  %v347_v22 = vld [vmem:[#allocation9] sm:$0xff]  ;;  %vm519_vm5 = vcmask 57344   ;;  %s700_s28 = scalar_lea.vmem %s528_s27, 32  ;;  %p701_p7 = scmp.lt.s32.totalorder %s528_s27, %s528_s27 }
  0x3b   :  { %574 = vmatpush3.msra.mxu1 %v94_v5  ;;  %578 = vmatprep.subr.mxu0 %v730_v1  ;;  %v350_v11 = vld [vmem:[#allocation9 + $0x18] sm:$0xff]  ;;  %v349_v20 = vld [vmem:[#allocation9 + $0x10] sm:$0xff]  ;;  %v441_v38 = vsub.s32 0, %v440_v37 }
  0x3c   :  { %576 = vmatmul.mubr.msk.f32.vlgmr.msra.gmra.mxu1 %vm175_vm3, %v92_v6  ;;  %586 = vmatprep.mubr.msk.f32.mxu0 %vm731_vm0, %v730_v1  ;;  %v543_v23 = vld [vmem:[%s848_s6] ss:$0 sm:$0xff] }
  0x3d   :  { %589 = vmatprep.subr.mxu1 %v730_v1  ;;  %597 = vmatprep.mubr.msk.f32.mxu1 %vm731_vm0, %v730_v1  ;;  %v433_v28 = vld [vmem:[#allocation2] sm:$0x1] }
  0x3e   :  { %579 = vmatpush3.msra.mxu0 %v264_v7  ;;  %590 = vmatpush3.msra.mxu1 %v350_v11  ;;  %v545_v30 = vld [vmem:[%s850_s8] ss:$0 sm:$0xff]  ;;  %s696_s8 = scalar_lea.vmem %s528_s27, 16 }
  0x3f   :  { %580 = vmatprep.subr.mxu0 %v730_v1  ;;  %591 = vmatprep.subr.mxu1 %v730_v1  ;;  %v432_v35 = vld [vmem:[%s851_s9] sm:$0x1]  ;;  %p697_p6 = scmp.ne.s32.totalorder %s528_s27, %s696_s8  ;;  %p702_p8 = scmp.lt.s32.totalorder %s700_s28, %s696_s8 }
  0x40   :  { %581 = vmatpush3.msra.mxu0 %v263_v8  ;;  %592 = vmatpush3.msra.mxu1 %v349_v20 }
  0x41   :  { %582 = vmatprep.subr.mxu0 %v730_v1  ;;  %593 = vmatprep.subr.mxu1 %v730_v1  ;;  %p703_p9 = por %p702_p8, %p701_p7 }
  0x42   :  { %583 = vmatpush3.msra.mxu0 %v262_v9  ;;  %594 = vmatpush3.msra.mxu1 %v348_v21 }
  0x43   :  { %584 = vmatprep.subr.mxu0 %v730_v1  ;;  %595 = vmatprep.subr.mxu1 %v730_v1  ;;  %p704_p10 = pnand %p703_p9, %p697_p6 }
  0x44   :  { %585 = vmatpush3.msra.mxu0 %v261_v10  ;;  %596 = vmatpush3.msra.mxu1 %v347_v22 }
  0x45   :  { %600 = vmatprep.subr.mxu0 %v730_v1  ;;  %615 = vset.pattern.permute.xlu0 %v732_v29 }
  0x46   :  { %436 = vperm.xlu0 %615, %v433_v28  }
  0xc1   :  { %v437_v39 = vpop.permute.xlu0 %436 }
  0xc2   :  { %v442_v40 = vrot.slane %v437_v39, %v441_v38 }
  0xfa   :  { %v171_v12 = vpop.f32.mrf.mxu0 }
  0xfc   :  { %v570_v13 = vpop.f32.mrf.mxu0  ;;  %v248_v14 = vpop.f32.mrf.mxu1 }
  0xfd   :  { %v249_v16 = vadd.f32 %v248_v14, %v171_v12 }
  0xfe   :  { %v577_v17 = vpop.f32.mrf.mxu1 }
  0xff   :  { %v259_v18 = vadd.f32 %v542_v15, %v249_v16 }
 0x101   :  { %v260_v19 = vmax.f32 %v259_v18, 0.0 }
 0x103   :  { %587 = vmatmul.mubr.msk.f32.vlgmr.msra.gmra.mxu0 %vm272_vm4, %v260_v19 }
 0x104   :  { %602 = vmatprep.mubr.msk.f32.mxu0 %vm731_vm0, %v730_v1 }
 0x1c3   :  { %v342_v24 = vpop.f32.mrf.mxu0 }
 0x1c4   :  { %v343_v25 = vadd.f32 %v543_v23, %v342_v24 }
 0x1c5   :  { %v588_v26 = vpop.f32.mrf.mxu0 }
 0x1c6   :  { %v346_v27 = vmax.f32 %v343_v25, 0.0 }
 0x1c8   :  { %598 = vmatmul.mubr.msk.f32.vlgmr.msra.gmra.mxu1 %vm272_vm4, %v346_v27 }
 0x288   :  { %v427_v31 = vpop.f32.mrf.mxu1 }
 0x289   :  { %v428_v32 = vadd.f32 %v545_v30, %v427_v31 }
 0x28a   :  { %v599_v33 = vpop.f32.mrf.mxu1 }
 0x28b   :  { %v431_v34 = vmax.f32 %v428_v32, 0.0 }
 0x28d   :  { %601 = vmatpush3.xpose.msk.msra.mxu0 %vm272_vm4, %v431_v34 }
 0x290   :  { %603 = vmatmul.mubr.msk.f32.vlgmr.msra.gmra.mxu0 %vm272_vm4, %v432_v35 }
 0x350   :  { %v515_v41 = vpop.f32.mrf.mxu0 }
 0x351   :  { %v516_v42 = vadd.f32 %v515_v41, %v442_v40 }
 0x352   :  { %v604_v43 = vpop.f32.mrf.mxu0 }
 0x353   :  { %520 = vst.msk [vmem:[#allocation11] sm:$0x1] %vm519_vm5, %v516_v42 }
 0x354   :  { %707 = shalt.err (!%p704_p10)
}
 0x355   :  { %530 = dma.vmem_to_hbm [thread:$0]  %s528_s27, 16, %s853_s11, [#allocation5]  }
 0x356   :  { %722 = dma.done.wait [#allocation5], 16  }
 0x357   :  { %723 = vsyncadd [#allocation5], 4294967280 }
 0x358   :  { %534 = vsyncpa [#allocation4], 1 }
 0x359   :  { %535 = vsyncpa [#allocation7], 1 }
 0x35a   :  { %536 = vsyncpa [#allocation10], 1 }
 0x35b   :  { %537 = vsyncpa [#allocation5], 1 }

</bundles_post_ra>
